<compile_context>
chip_gen: v5e
topology: v5e:2x2
jax: 0.10.0
libtpu: 0.0.40
codegen_flags: <defaults>
</compile_context>

<pallas_src>
import functools
import math

import jax
import jax.numpy as jnp
import numpy as np
from jax.experimental import pallas as pl
from jax.experimental.pallas import tpu as pltpu


_INV_SQRT2 = 1.0 / math.sqrt(2.0)


def _round_up(x, m):
    return ((x + m - 1) // m) * m


def _sublane_pack(dtype):
    # sublane packing: 8 rows for 4-byte, 16 for 2-byte, 32 for 1-byte dtypes
    return max(8, 32 // jnp.dtype(dtype).itemsize)


def _pick_div_tile(total, target, align):
    """Largest multiple of `align` that divides `total` and is <= target.
    Falls back to the full extent (single tile) when total <= target or no
    aligned divisor exists (correctness over footprint for odd sizes)."""
    if total <= target:
        return total
    t = (target // align) * align
    while t >= align:
        if total % t == 0:
            return t
        t -= align
    return total


def _pick_row_tile(M, block_m, pack):
    """Balanced row tile: minimal padding waste, sublane-pack aligned."""
    if M <= block_m:
        return _round_up(M, pack)
    n_tiles = pl.cdiv(M, block_m)
    return _round_up(pl.cdiv(M, n_tiles), pack)


def _vmem_cap_bytes():
    """Generation-aware VMEM cap with headroom for Mosaic internal scratch."""
    try:
        info = pltpu.get_tpu_info()
        cap = int(getattr(info, "vmem_capacity_bytes", 0)) or (128 << 20)
    except Exception:
        cap = 128 << 20
    return int(min(cap - (16 << 20), int(cap * 0.8)))


# ----------------------------------------------------------------------------
# Pallas kernel: one (tm, tn) output tile, reducing over hidden chunks of tk.
# ----------------------------------------------------------------------------
def _ffn_kernel(x_ref, w1_ref, b1_ref, w2_ref, b2_ref, o_ref, acc_ref, *, act):
    k = pl.program_id(2)

    @pl.when(k == 0)
    def _():
        acc_ref[...] = jnp.zeros_like(acc_ref)

    # fc1 partial for this hidden chunk: (tm, dim) @ (dim, tk) -> (tm, tk) f32
    h = jnp.dot(x_ref[...], w1_ref[...], preferred_element_type=jnp.float32)
    h = h + b1_ref[...].astype(jnp.float32)
    if act == "gelu":
        # Exact (erf-based) GELU — matches torch.nn.GELU() default.
        h = 0.5 * h * (1.0 + jax.lax.erf(h * jnp.float32(_INV_SQRT2)))
    else:  # 'relu'
        h = jnp.maximum(h, 0.0)
    # TODO(synk): nn.Dropout is identity in eval mode; no train-mode RNG path.

    # fc2 partial: (tm, tk) @ (tk, tn), accumulated in f32 scratch.
    acc_ref[...] += jnp.dot(h.astype(w2_ref.dtype), w2_ref[...],
                            preferred_element_type=jnp.float32)

    @pl.when(k == pl.num_programs(2) - 1)
    def _():
        o_ref[...] = (acc_ref[...]
                      + b2_ref[...].astype(jnp.float32)).astype(o_ref.dtype)


# ----------------------------------------------------------------------------
# Wrapper
# ----------------------------------------------------------------------------
def feed_forward(x, prepared, *, act="gelu",
                 block_m=512, block_n=512, block_k=1024):
    """x: (..., dim); `prepared` from prepare_params() (weights in (in, out))."""
    w1t = prepared["fc1_w"]          # (dim, hidden)
    b1 = prepared["fc1_b"]           # (1, hidden)
    w2t = prepared["fc2_w"]          # (hidden, out_dim)
    b2 = prepared["fc2_b"]           # (1, out_dim)

    lead = x.shape[:-1]
    dim = x.shape[-1]
    hidden = w1t.shape[1]
    out_dim = w2t.shape[1]

    x2d = x.reshape(-1, dim)
    M = x2d.shape[0]

    pack = _sublane_pack(x2d.dtype)
    tm = _pick_row_tile(M, block_m, pack)
    tk = _pick_div_tile(hidden, block_k, 128)
    tn = _pick_div_tile(out_dim, block_n, 128)

    grid = (pl.cdiv(M, tm), pl.cdiv(out_dim, tn), pl.cdiv(hidden, tk))

    # VMEM budget: double-buffered streamed tiles + f32 accumulator + f32 temp.
    ex = jnp.dtype(x2d.dtype).itemsize
    ew = jnp.dtype(w1t.dtype).itemsize
    est = (2 * tm * dim * ex          # x row tiles
           + 2 * dim * tk * ew        # w1 slabs
           + 2 * tk * tn * ew         # w2 slabs
           + 2 * (tk + tn) * ew       # bias slabs
           + 2 * tm * tn * ex         # output tiles
           + tm * tn * 4              # f32 accumulator scratch
           + tm * tk * 4)             # in-kernel f32 intermediate
    vmem_limit = int(min(max(int(est * 1.5) + (2 << 20), 8 << 20),
                         _vmem_cap_bytes()))

    kernel = functools.partial(_ffn_kernel, act=act)
    out = pl.pallas_call(
        kernel,
        out_shape=jax.ShapeDtypeStruct((M, out_dim), x.dtype),
        grid=grid,
        in_specs=[
            pl.BlockSpec((tm, dim), lambda i, j, k: (i, 0)),   # rows (per i)
            pl.BlockSpec((dim, tk), lambda i, j, k: (0, k)),   # w1 slab (per k)
            pl.BlockSpec((1, tk), lambda i, j, k: (0, k)),     # b1 slab
            pl.BlockSpec((tk, tn), lambda i, j, k: (k, j)),    # w2 slab
            pl.BlockSpec((1, tn), lambda i, j, k: (0, j)),     # b2 slab
        ],
        out_specs=pl.BlockSpec((tm, tn), lambda i, j, k: (i, j)),
        scratch_shapes=[pltpu.VMEM((tm, tn), jnp.float32)],
        compiler_params=pltpu.CompilerParams(
            dimension_semantics=("parallel", "parallel", "arbitrary"),
            vmem_limit_bytes=vmem_limit,
        ),
    )(x2d, w1t, b1, w2t, b2)

    return out.reshape(*lead, out_dim)


# ----------------------------------------------------------------------------
# Params (torch nn.Linear layout), one-time prep, and pure-JAX reference
# ----------------------------------------------------------------------------
def init_params(key, dim, hidden_dim, out_dim=None, dtype=jnp.float32):
    if out_dim is None:
        out_dim = dim
    k1, k2, k3, k4 = jax.random.split(key, 4)
    bound1 = 1.0 / math.sqrt(dim)
    bound2 = 1.0 / math.sqrt(hidden_dim)
    return {
        "fc1_w": jax.random.uniform(k1, (hidden_dim, dim), dtype, -bound1, bound1),
        "fc1_b": jax.random.uniform(k2, (hidden_dim,), dtype, -bound1, bound1),
        "fc2_w": jax.random.uniform(k3, (out_dim, hidden_dim), dtype, -bound2, bound2),
        "fc2_b": jax.random.uniform(k4, (out_dim,), dtype, -bound2, bound2),
    }


def prepare_params(params):
    """One-time transpose to (in, out) layout (done at load time, not per call)."""
    return {
        "fc1_w": jnp.asarray(params["fc1_w"]).T,       # (dim, hidden)
        "fc1_b": jnp.asarray(params["fc1_b"]).reshape(1, -1),
        "fc2_w": jnp.asarray(params["fc2_w"]).T,       # (hidden, out_dim)
        "fc2_b": jnp.asarray(params["fc2_b"]).reshape(1, -1),
    }


def reference(x, params, *, act="gelu"):
    h = x @ params["fc1_w"].T + params["fc1_b"]
    if act == "gelu":
        h = 0.5 * h * (1.0 + jax.lax.erf(h * _INV_SQRT2))
    else:
        h = jnp.maximum(h, 0.0)
    # dropout: identity (eval)
    return h @ params["fc2_w"].T + params["fc2_b"]


# ----------------------------------------------------------------------------
if __name__ == "__main__":
    root = jax.random.PRNGKey(0)
    kx, kp, kx2, kp2 = jax.random.split(root, 4)

    # 1) Default path: single tile on every axis, GELU.
    batch, seq, dim, hidden_dim = 2, 8, 32, 64
    x = jax.random.normal(kx, (batch, seq, dim), jnp.float32)
    params = init_params(kp, dim, hidden_dim)
    prep = prepare_params(params)
    out = jax.block_until_ready(feed_forward(x, prep, act="gelu"))
    ref = reference(x, params, act="gelu")
    np.testing.assert_allclose(np.asarray(out), np.asarray(ref),
                               rtol=1e-4, atol=1e-4)

    # 2) Full grid exercise: partial M tile (M=18, tm=8), 2 N tiles, 2 hidden
    #    chunks with the f32 accumulator.
    dim2, hid2, outd2 = 32, 256, 256
    params2 = init_params(kp2, dim2, hid2, out_dim=outd2)
    prep2 = prepare_params(params2)
    x_odd = jax.random.normal(kx2, (batch, 9, dim2), jnp.float32)
    out2 = jax.block_until_ready(
        feed_forward(x_odd, prep2, act="gelu",
                     block_m=8, block_n=128, block_k=128))
    ref2 = reference(x_odd, params2, act="gelu")
    np.testing.assert_allclose(np.asarray(out2), np.asarray(ref2),
                               rtol=1e-4, atol=1e-4)

    # 3) ReLU variant of the module.
    out3 = jax.block_until_ready(feed_forward(x, prep, act="relu"))
    ref3 = reference(x, params, act="relu")
    np.testing.assert_allclose(np.asarray(out3), np.asarray(ref3),
                               rtol=1e-4, atol=1e-4)

    print("KERNEL_OK")
</pallas_src>

<mosaic_0001>
module attributes {stable_mosaic.version = 11 : i64} {
  func.func @_ffn_kernel(%arg0: i32, %arg1: i32, %arg2: i32, %arg3: memref<16x32xf32, #tpu.memory_space<vmem>>, %arg4: memref<32x64xf32, #tpu.memory_space<vmem>>, %arg5: memref<1x64xf32, #tpu.memory_space<vmem>>, %arg6: memref<64x32xf32, #tpu.memory_space<vmem>>, %arg7: memref<1x32xf32, #tpu.memory_space<vmem>>, %arg8: memref<16x32xf32, #tpu.memory_space<vmem>>, %arg9: memref<16x32xf32, #tpu.memory_space<vmem>>) attributes {dimension_semantics = [#tpu.dimension_semantics<parallel>, #tpu.dimension_semantics<parallel>, #tpu.dimension_semantics<arbitrary>], iteration_bounds = array<i64: 1, 1, 1>, scalar_prefetch = 0 : i64, scratch_operands = 1 : i64, tpu.core_type = #tpu.core_type<tc>, window_params = [{transform_indices = @transform_0, window_bounds = array<i64: 16, 32>}, {transform_indices = @transform_1, window_bounds = array<i64: 32, 64>}, {transform_indices = @transform_2, window_bounds = array<i64: 1, 64>}, {transform_indices = @transform_3, window_bounds = array<i64: 64, 32>}, {transform_indices = @transform_4, window_bounds = array<i64: 1, 32>}, {transform_indices = @transform_5, window_bounds = array<i64: 16, 32>}]} {
    %c0_i32 = arith.constant 0 : i32
    %0 = arith.cmpi eq, %arg2, %c0_i32 : i32
    %1 = arith.extui %0 : i1 to i32
    %c0_i32_0 = arith.constant 0 : i32
    %2 = arith.cmpi ne, %1, %c0_i32_0 : i32
    scf.if %2 {
      %cst_18 = arith.constant 0.000000e+00 : f32
      %25 = vector.broadcast %cst_18 : f32 to vector<16x32xf32>
      %c0_19 = arith.constant 0 : index
      %c0_20 = arith.constant 0 : index
      %26 = vector.load %arg9[%c0_19, %c0_20] : memref<16x32xf32, #tpu.memory_space<vmem>>, vector<16x32xf32>
      tpu.vector_store %arg9[%c0_19, %c0_20], %25 {strides = array<i32>} : memref<16x32xf32, #tpu.memory_space<vmem>>, vector<16x32xf32>,
    } else {
    }
    %c0 = arith.constant 0 : index
    %c0_1 = arith.constant 0 : index
    %3 = vector.load %arg3[%c0, %c0_1] : memref<16x32xf32, #tpu.memory_space<vmem>>, vector<16x32xf32>
    %c0_2 = arith.constant 0 : index
    %c0_3 = arith.constant 0 : index
    %4 = vector.load %arg4[%c0_2, %c0_3] : memref<32x64xf32, #tpu.memory_space<vmem>>, vector<32x64xf32>
    %cst = arith.constant dense<0.000000e+00> : vector<16x64xf32>
    %5 = tpu.matmul %3, %4, %cst {dimension_numbers = #tpu.dot_dimension_numbers<[1], [0], [0], [1], [0, 0, 1, 1], [], []>} : vector<16x32xf32>, vector<32x64xf32>, vector<16x64xf32> -> vector<16x64xf32>
    %c0_4 = arith.constant 0 : index
    %c0_5 = arith.constant 0 : index
    %6 = vector.load %arg5[%c0_4, %c0_5] : memref<1x64xf32, #tpu.memory_space<vmem>>, vector<1x64xf32>
    %7 = vector.broadcast %6 : vector<1x64xf32> to vector<16x64xf32>
    %8 = arith.addf %5, %7 : vector<16x64xf32>
    %cst_6 = arith.constant 5.000000e-01 : f32
    %9 = vector.broadcast %cst_6 : f32 to vector<16x64xf32>
    %10 = arith.mulf %9, %8 : vector<16x64xf32>
    %cst_7 = arith.constant 0.707106769 : f32
    %11 = vector.broadcast %cst_7 : f32 to vector<16x64xf32>
    %12 = arith.mulf %8, %11 : vector<16x64xf32>
    %13 = math.erf %12 : vector<16x64xf32>
    %cst_8 = arith.constant 1.000000e+00 : f32
    %14 = vector.broadcast %cst_8 : f32 to vector<16x64xf32>
    %15 = arith.addf %14, %13 : vector<16x64xf32>
    %16 = arith.mulf %10, %15 : vector<16x64xf32>
    %c0_9 = arith.constant 0 : index
    %c0_10 = arith.constant 0 : index
    %17 = vector.load %arg9[%c0_9, %c0_10] : memref<16x32xf32, #tpu.memory_space<vmem>>, vector<16x32xf32>
    %c0_11 = arith.constant 0 : index
    %c0_12 = arith.constant 0 : index
    %18 = vector.load %arg6[%c0_11, %c0_12] : memref<64x32xf32, #tpu.memory_space<vmem>>, vector<64x32xf32>
    %cst_13 = arith.constant dense<0.000000e+00> : vector<16x32xf32>
    %19 = tpu.matmul %16, %18, %cst_13 {dimension_numbers = #tpu.dot_dimension_numbers<[1], [0], [0], [1], [0, 0, 1, 1], [], []>} : vector<16x64xf32>, vector<64x32xf32>, vector<16x32xf32> -> vector<16x32xf32>
    %20 = arith.addf %17, %19 : vector<16x32xf32>
    %c0_14 = arith.constant 0 : index
    %c0_15 = arith.constant 0 : index
    %21 = vector.load %arg9[%c0_14, %c0_15] : memref<16x32xf32, #tpu.memory_space<vmem>>, vector<16x32xf32>
    tpu.vector_store %arg9[%c0_14, %c0_15], %20 {strides = array<i32>} : memref<16x32xf32, #tpu.memory_space<vmem>>, vector<16x32xf32>,
    %c0_i32_16 = arith.constant 0 : i32
    %22 = arith.cmpi eq, %arg2, %c0_i32_16 : i32
    %23 = arith.extui %22 : i1 to i32
    %c0_i32_17 = arith.constant 0 : i32
    %24 = arith.cmpi ne, %23, %c0_i32_17 : i32
    scf.if %24 {
      %c0_18 = arith.constant 0 : index
      %c0_19 = arith.constant 0 : index
      %25 = vector.load %arg9[%c0_18, %c0_19] : memref<16x32xf32, #tpu.memory_space<vmem>>, vector<16x32xf32>
      %c0_20 = arith.constant 0 : index
      %c0_21 = arith.constant 0 : index
      %26 = vector.load %arg7[%c0_20, %c0_21] : memref<1x32xf32, #tpu.memory_space<vmem>>, vector<1x32xf32>
      %27 = vector.broadcast %26 : vector<1x32xf32> to vector<16x32xf32>
      %28 = arith.addf %25, %27 : vector<16x32xf32>
      %c0_22 = arith.constant 0 : index
      %c0_23 = arith.constant 0 : index
      %29 = vector.load %arg8[%c0_22, %c0_23] : memref<16x32xf32, #tpu.memory_space<vmem>>, vector<16x32xf32>
      tpu.vector_store %arg8[%c0_22, %c0_23], %28 {strides = array<i32>} : memref<16x32xf32, #tpu.memory_space<vmem>>, vector<16x32xf32>,
    } else {
    }
    return
  }
  func.func @transform_0(%arg0: i32, %arg1: i32, %arg2: i32) -> (i32, i32) {
    %c0_i32 = arith.constant 0 : i32
    %c0_i32_0 = arith.constant 0 : i32
    return %arg0, %c0_i32 : i32, i32
  }
  func.func @transform_1(%arg0: i32, %arg1: i32, %arg2: i32) -> (i32, i32) {
    %c0_i32 = arith.constant 0 : i32
    %c0_i32_0 = arith.constant 0 : i32
    return %c0_i32, %arg2 : i32, i32
  }
  func.func @transform_2(%arg0: i32, %arg1: i32, %arg2: i32) -> (i32, i32) {
    %c0_i32 = arith.constant 0 : i32
    %c0_i32_0 = arith.constant 0 : i32
    return %c0_i32, %arg2 : i32, i32
  }
  func.func @transform_3(%arg0: i32, %arg1: i32, %arg2: i32) -> (i32, i32) {
    %c0_i32 = arith.constant 0 : i32
    return %arg2, %arg1 : i32, i32
  }
  func.func @transform_4(%arg0: i32, %arg1: i32, %arg2: i32) -> (i32, i32) {
    %c0_i32 = arith.constant 0 : i32
    %c0_i32_0 = arith.constant 0 : i32
    return %c0_i32, %arg1 : i32, i32
  }
  func.func @transform_5(%arg0: i32, %arg1: i32, %arg2: i32) -> (i32, i32) {
    %c0_i32 = arith.constant 0 : i32
    return %arg0, %arg1 : i32, i32
  }
}

</mosaic_0001>

<bundles_post_ra>
// kernel: tpu_custom_call.1
= control target key start
LH: loop header
LB: loop body
LE: loop exit
PB: predicated region body
PF: predicated region fallthrough
CT: control target
= control target key end

     0   :  { %s420_s0 = inlined_call_operand.vmem [shape: f32[16,32], index: 0, kind: input, shape index: {}]   ;;  %s421_s1 = inlined_call_operand.vmem [shape: f32[32,64], index: 1, kind: input, shape index: {}]   ;;  %s422_s2 = inlined_call_operand.vmem [shape: f32[1,64], index: 2, kind: input, shape index: {}]   ;;  %s423_s3 = inlined_call_operand.vmem [shape: f32[64,32], index: 3, kind: input, shape index: {}]   ;;  %s424_s4 = inlined_call_operand.vmem [shape: f32[1,32], index: 4, kind: input, shape index: {}]   ;;  %s425_s5 = inlined_call_operand.hbm [shape: f32[16,32], index: 5, kind: output, shape index: {}]  }
   0x1   :  { %v33_v0 = vld [vmem:[%s421_s1 + $0x18] sm:$0xff]  ;;  %v32_v1 = vld [vmem:[%s421_s1 + $0x10] sm:$0xff]  ;;  %v31_v2 = vld [vmem:[%s421_s1 + $0x8] sm:$0xff] }
   0x2   :  { %57 = vmatpush.msra.mxu0 %v33_v0  ;;  %237 = vmatpush.msra.mxu3 %v33_v0 }
   0x3   :  { %10 = vsyncpa [#allocation4], 0  ;;  %v30_v3 = vld [vmem:[%s421_s1] sm:$0xff]  ;;  %vm25_vm0 = vcmask 261120   ;;  %v29_v5 = vld [vmem:[%s420_s0 + $0x8] sm:$0xff]  ;;  %v285_v56 = vmov 0.0  }
   0x4   :  { %58 = vmatpush.msra.mxu0 %v32_v1  ;;  %238 = vmatpush.msra.mxu3 %v32_v1  ;;  %v28_v4 = vld [vmem:[%s420_s0] sm:$0xff]  ;;  %v165_v14 = vld [vmem:[%s423_s3 + $0x38] sm:$0xff]  ;;  %v164_v18 = vld [vmem:[%s423_s3 + $0x30] sm:$0xff]  ;;  %26 = vst.msk [vmem:[#allocation2] sm:$0xff] %vm25_vm0, %v285_v56  ;;  %vm166_vm9 = vcmask 523264   ;;  %s286_s21 = smov [#allocation3]  }
   0x5   :  { %v253_v6 = vld [vmem:[%s422_s2] ss:$0 sm:$0xff]  ;;  %181 = vmatpush.msra.mxu1 %v165_v14  ;;  %241 = vmatpush.msra.mxu2 %v165_v14  ;;  %v163_v22 = vld [vmem:[%s423_s3 + $0x28] sm:$0xff]  ;;  %v161_v31 = vld [vmem:[%s423_s3 + $0x18] sm:$0xff]  ;;  %27 = vst.msk [vmem:[#allocation2 + $0x8] sm:$0xff] %vm25_vm0, %v285_v56  ;;  %s217_s22 = sshll.u32 %s286_s21, 4  ;;  %s218_s22 = int_to_ptr.vmem [resolvable:$true] %s217_s22 }
   0x6   :  { %59 = vmatpush.msra.mxu0 %v31_v2  ;;  %239 = vmatpush.msra.mxu3 %v31_v2  ;;  %v162_v26 = vld [vmem:[%s423_s3 + $0x20] sm:$0xff]  ;;  %v160_v35 = vld [vmem:[%s423_s3 + $0x10] sm:$0xff]  ;;  %v159_v40 = vld [vmem:[%s423_s3 + $0x8] sm:$0xff]  ;;  %s219_s25 = sshll.u32 %s425_s5, 4  ;;  %s288_s26 = smov 8   ;;  %s220_s25 = int_to_ptr.hbm [resolvable:$true] %s219_s25 }
   0x7   :  { %182 = vmatpush.msra.mxu1 %v164_v18  ;;  %242 = vmatpush.msra.mxu2 %v164_v18  ;;  %v158_v42 = vld [vmem:[%s423_s3] sm:$0xff] }
   0x8   :  { %60 = vmatpush.msra.mxu0 %v30_v3  ;;  %240 = vmatpush.msra.mxu3 %v30_v3 }
   0x9   :  { %231 = vmatmul.msk.f32.vlgmr.msra.gmra.mxu0 %vm25_vm0, %v28_v4  ;;  %232 = vmatmul.msk.f32.vlgmr.msra.gmra.mxu3 %vm25_vm0, %v29_v5 }
   0xa   :  { %183 = vmatpush.msra.mxu1 %v163_v22  ;;  %243 = vmatpush.msra.mxu2 %v163_v22 }
   0xc   :  { %184 = vmatpush.msra.mxu1 %v162_v26  ;;  %244 = vmatpush.msra.mxu2 %v162_v26 }
   0xe   :  { %185 = vmatpush.msra.mxu1 %v161_v31  ;;  %245 = vmatpush.msra.mxu2 %v161_v31 }
  0x10   :  { %186 = vmatpush.msra.mxu1 %v160_v35  ;;  %246 = vmatpush.msra.mxu2 %v160_v35 }
  0x12   :  { %187 = vmatpush.msra.mxu1 %v159_v40  ;;  %247 = vmatpush.msra.mxu2 %v159_v40  ;;  %v157_v40 = vld [vmem:[#allocation2 + $0x8] sm:$0xff] }
  0x14   :  { %188 = vmatpush.msra.mxu1 %v158_v42  ;;  %248 = vmatpush.msra.mxu2 %v158_v42 }
  0x86   :  { %v62_v7 = vpop.f32.mrf.mxu0 }
  0x87   :  { %v342_v8 = vadd.f32 %v253_v6, %v62_v7 }
  0x89   :  { %v345_v9 = vmul.f32 0.70710677, %v342_v8 }
  0x8b   :  { %v72_v10 = vmul.f32 %v345_v9, %v345_v9 }
  0x8c   :  { %v65_v11 = vpop.f32.mrf.mxu3 }
  0x8d   :  { %v349_v12 = vmin.f32 %v72_v10, 16.0  ;;  %v351_v13 = vadd.f32 %v253_v6, %v65_v11 }
  0x8f   :  { %v74_v15 = vmul.f32 2.1237322e-06, %v349_v12  ;;  %v85_v16 = vmul.f32 3.8918573e-05, %v349_v12  ;;  %v359_v17 = vmul.f32 0.70710677, %v351_v13 }
  0x91   :  { %v75_v19 = vadd.f32 0.00028619796, %v74_v15  ;;  %v86_v20 = vadd.f32 0.001143296, %v85_v16  ;;  %v112_v21 = vmul.f32 %v359_v17, %v359_v17 }
  0x93   :  { %v76_v23 = vmul.f32 %v75_v19, %v349_v12  ;;  %v87_v24 = vmul.f32 %v86_v20, %v349_v12  ;;  %v371_v25 = vmin.f32 %v112_v21, 16.0 }
  0x95   :  { %v77_v27 = vadd.f32 0.0036580483, %v76_v23  ;;  %v88_v28 = vadd.f32 0.014752088, %v87_v24  ;;  %v114_v29 = vmul.f32 2.1237322e-06, %v371_v25 }
  0x96   :  { %v125_v30 = vmul.f32 3.8918573e-05, %v371_v25 }
  0x97   :  { %v89_v32 = vmul.f32 %v88_v28, %v349_v12  ;;  %v115_v33 = vadd.f32 0.00028619796, %v114_v29  ;;  %v78_v37 = vmul.f32 %v77_v27, %v349_v12  ;;  %v68_v27 = vmul.f32 0.5, %v342_v8 }
  0x98   :  { %v126_v34 = vadd.f32 0.001143296, %v125_v30 }
  0x99   :  { %v90_v36 = vadd.f32 0.112945676, %v89_v32  ;;  %v116_v38 = vmul.f32 %v115_v33, %v371_v25  ;;  %v79_v46 = vadd.f32 0.05243302, %v78_v37  ;;  %v156_v37 = vld [vmem:[#allocation2] sm:$0xff] }
  0x9a   :  { %v127_v39 = vmul.f32 %v126_v34, %v371_v25  ;;  %v69_v34 = vmul.f32 0.5, %v351_v13 }
  0x9b   :  { %v91_v41 = vmul.f32 %v90_v36, %v349_v12  ;;  %v117_v45 = vadd.f32 0.0036580483, %v116_v38  ;;  %v80_v52 = vmul.f32 %v79_v46, %v349_v12 }
  0x9c   :  { %v128_v43 = vadd.f32 0.014752088, %v127_v39 }
  0x9d   :  { %v92_v44 = vadd.f32 0.4994258, %v91_v41  ;;  %v118_v51 = vmul.f32 %v117_v45, %v371_v25  ;;  %v81_v57 = vadd.f32 0.18741608, %v80_v52 }
  0x9e   :  { %v129_v47 = vmul.f32 %v128_v43, %v371_v25 }
  0x9f   :  { %v93_v48 = vmul.f32 %v92_v44, %v349_v12  ;;  %v119_v55 = vadd.f32 0.05243302, %v118_v51  ;;  %v82_v62 = vmul.f32 %v81_v57, %v349_v12 }
  0xa0   :  { %v130_v49 = vadd.f32 0.112945676, %v129_v47 }
  0xa1   :  { %v94_v50 = vadd.f32 1.0, %v93_v48  ;;  %v120_v61 = vmul.f32 %v119_v55, %v371_v25  ;;  %v83_v3 = vadd.f32 1.1283791, %v82_v62 }
  0xa2   :  { %v131_v53 = vmul.f32 %v130_v49, %v371_v25 }
  0xa3   :  { %255 = vrcp.f32 %v94_v50  ;;  %v106_v1 = vand.u32 2147483648, %v94_v50  ;;  %v121_v2 = vadd.f32 0.18741608, %v120_v61  ;;  %v104_v5 = vand.u32 2147483647, %v94_v50 }
  0xa4   :  { %v132_v54 = vadd.f32 0.4994258, %v131_v53  ;;  %vm100_vm2 = vweird.f32 %v94_v50  ;;  %v84_v15 = vmul.f32 %v83_v3, %v345_v9 }
  0xa5   :  { %v107_v10 = vor.u32 1.1754944e-38, %v106_v1  ;;  %v122_v11 = vmul.f32 %v121_v2, %v371_v25  ;;  %vm105_vm4 = vcmp.eq.f32.partialorder %v104_v5, 8.507059e+37 }
  0xa6   :  { %v133_v58 = vmul.f32 %v132_v54, %v371_v25 }
  0xa7   :  { %v123_v21 = vadd.f32 1.1283791, %v122_v11 }
  0xa8   :  { %v134_v59 = vadd.f32 1.0, %v133_v58 }
  0xa9   :  { %v256_v60 = vpop.eup %255  ;;  %v124_v9 = vmul.f32 %v123_v21, %v359_v17  ;;  %v254_v17 = vld [vmem:[%s424_s4] ss:$0 sm:$0xff]  ;;  %s287_s4 = smov 128  }
  0xaa   :  { %v96_v63 = vmul.f32 %v256_v60, %v94_v50  ;;  %257 = vrcp.f32 %v134_v59  ;;  %vm101_vm1 = vweird.f32 %v256_v60  ;;  %v146_v20 = vand.u32 2147483648, %v134_v59 }
  0xab   :  { %vm102_vm3 = vmor %vm100_vm2, %vm101_vm1  ;;  %v144_v23 = vand.u32 2147483647, %v134_v59  ;;  %vm140_vm6 = vweird.f32 %v134_v59 }
  0xac   :  { %v97_v0 = vsub.f32 1.0, %v96_v63  ;;  %v147_v25 = vor.u32 1.1754944e-38, %v146_v20 }
  0xad   :  { %vm145_vm8 = vcmp.eq.f32.partialorder %v144_v23, 8.507059e+37 }
  0xae   :  { %v98_v4 = vmul.f32 %v256_v60, %v97_v0 }
  0xb0   :  { %v258_v6 = vpop.eup %257  ;;  %v99_v7 = vadd.f32 %v256_v60, %v98_v4 }
  0xb1   :  { %v136_v14 = vmul.f32 %v258_v6, %v134_v59  ;;  %vm141_vm5 = vweird.f32 %v258_v6 }
  0xb2   :  { %v103_v12 = vsel %vm102_vm3, %v256_v60, %v99_v7  ;;  %vm142_vm7 = vmor %vm140_vm6, %vm141_vm5 }
  0xb3   :  { %v108_v16 = vsel %vm105_vm4, %v107_v10, %v103_v12  ;;  %v137_v18 = vsub.f32 1.0, %v136_v14 }
  0xb4   :  { %v109_v19 = vmul.f32 %v108_v16, %v84_v15 }
  0xb5   :  { %v138_v22 = vmul.f32 %v258_v6, %v137_v18 }
  0xb6   :  { %v233_v24 = vclamps-f32 %v109_v19, 1.0 }
  0xb7   :  { %v139_v26 = vadd.f32 %v258_v6, %v138_v22 }
  0xb8   :  { %v152_v28 = vadd.f32 1.0, %v233_v24 }
  0xb9   :  { %v143_v29 = vsel %vm142_vm7, %v258_v6, %v139_v26 }
  0xba   :  { %v148_v30 = vsel %vm145_vm8, %v147_v25, %v143_v29  ;;  %v154_v31 = vmul.f32 %v152_v28, %v68_v27 }
  0xbb   :  { %v149_v32 = vmul.f32 %v148_v30, %v124_v9 }
  0xbc   :  { %235 = vmatmul.msk.f32.vlgmr.msra.gmra.mxu1 %vm166_vm9, %v154_v31 }
  0xbd   :  { %v234_v33 = vclamps-f32 %v149_v32, 1.0 }
  0xbf   :  { %v153_v35 = vadd.f32 1.0, %v234_v33 }
  0xc1   :  { %v155_v36 = vmul.f32 %v153_v35, %v69_v34 }
  0xc3   :  { %236 = vmatmul.msk.f32.vlgmr.msra.gmra.mxu2 %vm166_vm9, %v155_v36 }
 0x139   :  { %v190_v8 = vpop.f32.mrf.mxu1 }
 0x13a   :  { %v196_v38 = vadd.f32 %v190_v8, %v156_v37 }
 0x13c   :  { %198 = vst.msk [vmem:[#allocation2] sm:$0xff] %vm25_vm0, %v196_v38 }
 0x143   :  { %v203_v39 = vld [vmem:[#allocation2] sm:$0xff] }
 0x144   :  { %v209_v41 = vadd.f32 %v254_v17, %v203_v39 }
 0x146   :  { %v193_v42 = vpop.f32.mrf.mxu2  ;;  %211 = vst.msk [vmem:[#allocation3] sm:$0xff] %vm25_vm0, %v209_v41 }
 0x147   :  { %v197_v43 = vadd.f32 %v193_v42, %v157_v40 }
 0x149   :  { %199 = vst.msk [vmem:[#allocation2 + $0x8] sm:$0xff] %vm25_vm0, %v197_v43 }
 0x150   :  { %v204_v13 = vld [vmem:[#allocation2 + $0x8] sm:$0xff] }
 0x151   :  { %v210_v44 = vadd.f32 %v254_v17, %v204_v13 }
 0x153   :  { %212 = vst.msk [vmem:[#allocation3 + $0x8] sm:$0xff] %vm25_vm0, %v210_v44 }
 0x154   :  { %225 = dma.vmem_to_hbm [thread:$0]  %s218_s22, 256, %s220_s25, [#allocation4], %s287_s4, %s287_s4, %s288_s26  }
 0x155   :  { %283 = dma.done.wait [#allocation4], 256  }
 0x156   :  { %284 = vsyncadd [#allocation4], 4294967040 }
 0x157   :  { %230 = vsyncpa [#allocation4], 1 }

</bundles_post_ra>
